<compile_context>
chip_gen: v7x
topology: tpu7x:2x2x1
jax: 0.10.0
libtpu: 0.0.40
codegen_flags: <defaults>
</compile_context>

<pallas_src>
import jax
import jax.numpy as jnp
from jax.experimental import pallas as pl
from jax.experimental.pallas import tpu as pltpu

_LANE = 128
_SUBLANE = 8
_TARGET_TILE_BYTES = 8 * 1024 * 1024    # per live buffer (review: 6-8 MiB sweet spot)
_VMEM_LIMIT_BYTES = 48 * 1024 * 1024    # 2 in + 2 out buffers (32 MiB) + headroom; fits v7x 64 MiB
_SMALL_INPUT_BYTES = 256 * 1024         # below this, plain XLA beats the custom-call fixed cost


def _scale_kernel(tau_ref, x_ref, o_ref):
    # tau_ref: (1,) scalar parameter in SMEM.
    # x_ref / o_ref: (tile_rows, cols) VMEM tiles (batch dim squeezed away).
    o_ref[...] = tau_ref[0] * x_ref[...]


def _choose_lanes(n):
    """Largest multiple-of-128 lane width dividing n, preferring rows >= 8."""
    for lanes in (2048, 1024, 512, 256, 128):
        if n % lanes == 0 and (n // lanes) >= _SUBLANE:
            return lanes
    for lanes in (2048, 1024, 512, 256, 128):
        if n % lanes == 0:
            return lanes
    return None


def _choose_tile(extent, row_bytes):
    """Tile length along the grid axis: ~8 MiB per tile, multiple of 8, or full extent."""
    t = max(1, _TARGET_TILE_BYTES // max(1, row_bytes))
    t = max(_SUBLANE, (t // _SUBLANE) * _SUBLANE)
    if t >= extent:
        return extent  # full extent along the tiled axis -> always legal
    return t           # multiple of 8; trailing partial block handled by Pallas


def taunet_forward(tauM, tauN, inp, *, force_pallas=False):
    """Pallas implementation of TauNet.forward.

    tauM, tauN: (1,) float32 parameters (tauN unused in forward, kept for parity).
    inp:        (B, ...) float32 batched tensor (e.g. NCHW like PyTorch).
    returns:    inp[0].shape float32  ==  tauM * inp[0]
    """
    del tauN  # not used in the forward pass (matches the PyTorch module)

    out_shape = inp.shape[1:]
    dtype = inp.dtype
    itemsize = jnp.dtype(dtype).itemsize
    n = 1
    for d in out_shape:
        n *= d
    B = inp.shape[0]

    # Small-input fast path: below a few hundred KiB the pallas_call fixed
    # cost (launch + DMA setup + one grid step) dominates; XLA fuses the
    # scalar multiply into a single pass.
    small = (not force_pallas) and (n * itemsize < _SMALL_INPUT_BYTES)
    if small or inp.ndim < 2 or n == 0:
        return tauM[0] * inp[0]

    # NOTE: "parallel" is kept (portable across v5e/v6e/v7x); CORE_PARALLEL is
    # the lever to try if an xprof trace shows one idle TC on v7x.
    compiler_params = pltpu.CompilerParams(
        dimension_semantics=("parallel",),
        vmem_limit_bytes=_VMEM_LIMIT_BYTES,
    )
    cost = pl.CostEstimate(
        flops=n,
        transcendentals=0,
        bytes_accessed=2 * n * itemsize,  # only inp[0] is read, plus the write
    )

    if n % _LANE == 0:
        # Lane-dense path: contiguous reshape of the whole batch (no data
        # movement); inp[0] selection happens inside the kernel via the pinned
        # squeezed leading dim, so only the first batch element is DMA'd.
        lanes = _choose_lanes(n)
        rows = n // lanes
        x_in = inp.reshape(B, rows, lanes)
        tr = _choose_tile(rows, lanes * itemsize)
        grid = (pl.cdiv(rows, tr),)

        out2d = pl.pallas_call(
            _scale_kernel,
            out_shape=jax.ShapeDtypeStruct((rows, lanes), dtype),
            grid=grid,
            in_specs=[
                # Scalar parameter: whole (1,) array, resident in SMEM.
                pl.BlockSpec(memory_space=pltpu.MemorySpace.SMEM),
                # (batch, rows, lanes): batch dim squeezed (None) and pinned to
                # block 0 == inp[0]; the row axis is tiled.
                pl.BlockSpec((None, tr, lanes), lambda i: (0, i, 0)),
            ],
            out_specs=pl.BlockSpec((tr, lanes), lambda i: (i, 0)),
            compiler_params=compiler_params,
            cost_estimate=cost,
        )(tauM, x_in)
        return out2d.reshape(out_shape)

    # Natural-layout fallback for element counts not divisible by 128:
    # present inp as (B, d0, rest) and tile only d0.  The trailing block dim
    # equals the full array extent (exempt from the 128 rule), so there is no
    # wrapper pad/slice and no extra HBM passes.
    d0 = inp.shape[1]
    rest = n // d0
    x_in = inp.reshape(B, d0, rest)
    td = _choose_tile(d0, rest * itemsize)
    grid = (pl.cdiv(d0, td),)

    out2d = pl.pallas_call(
        _scale_kernel,
        out_shape=jax.ShapeDtypeStruct((d0, rest), dtype),
        grid=grid,
        in_specs=[
            pl.BlockSpec(memory_space=pltpu.MemorySpace.SMEM),
            pl.BlockSpec((None, td, rest), lambda i: (0, i, 0)),
        ],
        out_specs=pl.BlockSpec((td, rest), lambda i: (i, 0)),
        compiler_params=compiler_params,
        cost_estimate=cost,
    )(tauM, x_in)
    return out2d.reshape(out_shape)


if __name__ == "__main__":
    # Deterministic parameter init (matches nn.Parameter(torch.tensor([5.0]))).
    tauM = jnp.array([5.0], dtype=jnp.float32)
    tauN = jnp.array([5.0], dtype=jnp.float32)

    # Small deterministic input: batch=2, channels=4, spatial=16 (NCHW).
    key = jax.random.PRNGKey(0)
    inp = jax.random.normal(key, (2, 4, 16, 16), dtype=jnp.float32)
    ref = tauM[0] * inp[0]

    # 1) Default dispatch: tiny input takes the fused XLA fast path.
    out_fast = jax.block_until_ready(taunet_forward(tauM, tauN, inp))
    assert out_fast.shape == ref.shape == (4, 16, 16)
    assert jnp.allclose(out_fast, ref, atol=1e-6, rtol=1e-6)

    # 2) Force the Pallas kernel on the same small shape to exercise it.
    out_pallas = jax.block_until_ready(
        taunet_forward(tauM, tauN, inp, force_pallas=True))
    assert out_pallas.shape == ref.shape
    assert jnp.allclose(out_pallas, ref, atol=1e-6, rtol=1e-6)

    # 3) A larger shape above the dispatch threshold that exercises the real
    #    row grid (inp[0] is 16 MiB -> two 8 MiB tiles, double-buffered).
    inp_big = jax.random.normal(jax.random.PRNGKey(0), (2, 16, 512, 512),
                                dtype=jnp.float32)
    out_big = jax.block_until_ready(taunet_forward(tauM, tauN, inp_big))
    ref_big = tauM[0] * inp_big[0]
    assert out_big.shape == ref_big.shape == (16, 512, 512)
    assert jnp.allclose(out_big, ref_big, atol=1e-6, rtol=1e-6)

    print("KERNEL_OK")
</pallas_src>

<mosaic_0001>
module attributes {stable_mosaic.version = 11 : i64} {
  func.func @_scale_kernel(%arg0: i32, %arg1: memref<1xf32, #tpu.memory_space<smem>>, %arg2: memref<1x8x128xf32, #tpu.memory_space<vmem>>, %arg3: memref<8x128xf32, #tpu.memory_space<vmem>>) attributes {dimension_semantics = [#tpu.dimension_semantics<parallel>], iteration_bounds = array<i64: 1>, scalar_prefetch = 0 : i64, scratch_operands = 0 : i64, tpu.core_type = #tpu.core_type<tc>, window_params = [{transform_indices = @transform_0, window_bounds = array<i64: 1>}, {transform_indices = @transform_1, window_bounds = array<i64: 1, 8, 128>}, {transform_indices = @transform_2, window_bounds = array<i64: 8, 128>}]} {
    %c0 = arith.constant 0 : index
    %0 = memref.load %arg1[%c0] : memref<1xf32, #tpu.memory_space<smem>>
    %c0_0 = arith.constant 0 : index
    %c0_1 = arith.constant 0 : index
    %c0_2 = arith.constant 0 : index
    %1 = vector.load %arg2[%c0_0, %c0_1, %c0_2] : memref<1x8x128xf32, #tpu.memory_space<vmem>>, vector<1x8x128xf32>
    %2 = vector.shape_cast %1 : vector<1x8x128xf32> to vector<8x128xf32>
    %3 = vector.broadcast %0 : f32 to vector<8x128xf32>
    %4 = arith.mulf %3, %2 : vector<8x128xf32>
    %c0_3 = arith.constant 0 : index
    %c0_4 = arith.constant 0 : index
    %5 = vector.load %arg3[%c0_3, %c0_4] : memref<8x128xf32, #tpu.memory_space<vmem>>, vector<8x128xf32>
    tpu.vector_store %arg3[%c0_3, %c0_4], %4 {strides = array<i32>} : memref<8x128xf32, #tpu.memory_space<vmem>>, vector<8x128xf32>,
    return
  }
  func.func @transform_0(%arg0: i32) -> i32 {
    %c0_i32 = arith.constant 0 : i32
    %c0_i32_0 = arith.constant 0 : i32
    return %c0_i32 : i32
  }
  func.func @transform_1(%arg0: i32) -> (i32, i32, i32) {
    %c0_i32 = arith.constant 0 : i32
    %c0_i32_0 = arith.constant 0 : i32
    %c0_i32_1 = arith.constant 0 : i32
    return %c0_i32, %arg0, %c0_i32_0 : i32, i32, i32
  }
  func.func @transform_2(%arg0: i32) -> (i32, i32) {
    %c0_i32 = arith.constant 0 : i32
    %c0_i32_0 = arith.constant 0 : i32
    return %arg0, %c0_i32 : i32, i32
  }
}

</mosaic_0001>

<bundles_post_ra>
// kernel: tpu_custom_call.1
= control target key start
LH: loop header
LB: loop body
LE: loop exit
PB: predicated region body
PF: predicated region fallthrough
CT: control target
= control target key end

     0   :  { %8 = vsyncpa [#allocation4], 0  ;;  %s142_s0 = inlined_call_operand.<no memory space> [shape: f32[1], index: 0, kind: input, shape index: {}]   ;;  %s143_s1 = inlined_call_operand.hbm [shape: f32[2,8,128], index: 1, kind: input, shape index: {}]   ;;  %s144_s2 = inlined_call_operand.hbm [shape: f32[8,128], index: 2, kind: output, shape index: {}]  }
   0x1   :  { %9 = vsyncpa [#allocation5], 0  ;;  %s95_s9 = smov [#allocation3]   ;;  %s47_s13 = scalar_lea.hbm %s143_s1, 128 }
   0x2   :  { %s18_s10 = sshll.u32 %s95_s9, 4  ;;  %p48_p0 = scmp.ne.s32.totalorder %s143_s1, %s47_s13  ;;  %s19_s10 = int_to_ptr.vmem [resolvable:$true] %s18_s10 }
   0x3   :  { %s49_s18 = scalar_lea.hbm %s143_s1, 256  ;;  %p51_p2 = scmp.lt.u32.totalorder %s47_s13, %s143_s1 }
   0x4   :  { %p50_p1 = scmp.lt.u32.totalorder %s49_s18, %s47_s13 }
   0x6   :  { %p52_p3 = por %p51_p2, %p50_p1 }
   0x8   :  { %p53_p4 = pnand %p52_p3, %p48_p0 }
   0xa   :  { %56 = shalt.err (!%p53_p4)
}
   0xb   :  { %s57_s21 = scalar_lea.vmem %s19_s10, 128  ;;  %p62_p6 = scmp.lt.s32.totalorder %s19_s10, %s19_s10 }
   0xc   :  { %p58_p5 = scmp.ne.s32.totalorder %s19_s10, %s57_s21  ;;  %p63_p7 = scmp.lt.s32.totalorder %s57_s21, %s57_s21 }
   0xe   :  { %p64_p8 = por %p63_p7, %p62_p6 }
  0x10   :  { %p65_p9 = pnand %p64_p8, %p58_p5 }
  0x12   :  { %68 = shalt.err (!%p65_p9)
}
  0x13   :  { %21 = dma.hbm_to_vmem [thread:$0]  %s143_s1, 128, %s19_s10, [#allocation4]  }
  0x14   :  { %91 = dma.done.wait [#allocation4], 128  }
  0x15   :  { %92 = vsyncadd [#allocation4], 4294967168  ;;  %v27_v0 = vstv %s142_s0  ;;  %s96_s26 = smov [#allocation6]   ;;  %v26_v1 = vld [vmem:[#allocation3] sm:$0xff] }
  0x16   :  { %s36_s27 = sshll.u32 %s96_s26, 4  ;;  %v28_v2 = vmul.f32 %v27_v0, %v26_v1  ;;  %s37_s27 = int_to_ptr.vmem [resolvable:$true] %s36_s27 }
  0x17   :  { %s69_s28 = scalar_lea.vmem %s37_s27, 128  ;;  %p74_p11 = scmp.lt.s32.totalorder %s37_s27, %s37_s27 }
  0x18   :  { %29 = vst [vmem:[#allocation6] sm:$0xff] %v28_v2  ;;  %p70_p10 = scmp.ne.s32.totalorder %s37_s27, %s69_s28  ;;  %p75_p12 = scmp.lt.s32.totalorder %s69_s28, %s69_s28 }
  0x1a   :  { %p76_p13 = por %p75_p12, %p74_p11 }
  0x1c   :  { %p77_p0 = pnand %p76_p13, %p70_p10 }
  0x1e   :  { %80 = shalt.err (!%p77_p0)
}
  0x1f   :  { %s81_s30 = scalar_lea.hbm %s144_s2, 128 }
  0x20   :  { %p82_p1 = scmp.ne.s32.totalorder %s144_s2, %s81_s30  ;;  %p85_p2 = scmp.lt.u32.totalorder %s81_s30, %s144_s2 }
  0x22   :  { %p87_p3 = pnand %p85_p2, %p82_p1 }
  0x24   :  { %90 = shalt.err (!%p87_p3)
}
  0x25   :  { %39 = dma.vmem_to_hbm [thread:$0]  %s37_s27, 128, %s144_s2, [#allocation5]  }
  0x26   :  { %93 = dma.done.wait [#allocation5], 128  }
  0x27   :  { %94 = vsyncadd [#allocation5], 4294967168 }
  0x28   :  { %43 = vsyncpa [#allocation4], 1 }
  0x29   :  { %44 = vsyncpa [#allocation5], 1 }

</bundles_post_ra>
